<compile_context>
chip_gen: v5e
topology: v5e:2x2
jax: 0.10.0
libtpu: 0.0.40
codegen_flags: <defaults>
</compile_context>

<pallas_src>
import functools

import jax
import jax.numpy as jnp
from jax.experimental import pallas as pl
from jax.experimental.pallas import tpu as pltpu


def _round_up(x, m):
    return (x + m - 1) // m * m


def _dae_kernel(x_ref, w1_ref, b1_ref, w2_ref, b2_ref,
                w3_ref, b3_ref, w4_ref, b4_ref, o_ref):
    cdt = w1_ref.dtype                    # MXU operand dtype (f32 or bf16)
    x = x_ref[...].astype(cdt)            # in-kernel cast: no extra HBM copy of x

    # encoder: Linear(D,128) + ReLU, Linear(128,64) + ReLU
    h = jnp.dot(x, w1_ref[...], preferred_element_type=jnp.float32) + b1_ref[...]
    h = jnp.maximum(h, 0.0)
    h = jnp.dot(h.astype(cdt), w2_ref[...],
                preferred_element_type=jnp.float32) + b2_ref[...]
    h = jnp.maximum(h, 0.0)

    # decoder: Linear(64,128) + ReLU, Linear(128,D) + Sigmoid
    h = jnp.dot(h.astype(cdt), w3_ref[...],
                preferred_element_type=jnp.float32) + b3_ref[...]
    h = jnp.maximum(h, 0.0)
    logits = jnp.dot(h.astype(cdt), w4_ref[...],
                     preferred_element_type=jnp.float32) + b4_ref[...]

    o_ref[...] = jax.nn.sigmoid(logits).astype(o_ref.dtype)


def _vmem_limit_bytes():
    # v7x: 64 MiB physical per TC -> ~52 MiB scoped; v5e/v6e: 128 MiB -> ~100 MiB.
    try:
        cap = int(pltpu.get_tpu_info().vmem_capacity_bytes)
    except Exception:
        cap = 128 << 20
    return min(int(cap * 0.8), 100 << 20)


def _pick_block_b(B, D, bytes_in, bytes_out, bytes_w, vmem_limit):
    """Largest batch tile (multiple of 16) that fits the VMEM budget."""
    # Per-row VMEM: double-buffered x stream + double-buffered out stream +
    # f32 logits/hidden-activation temporaries materialized by the compiler.
    per_row = D * (2 * bytes_in + 2 * bytes_out + 4) + 3 * 128 * 4
    weight_bytes = (2 * D * 128 + 2 * 128 * 64) * bytes_w + 4 * (2 * 128 + 64 + D)
    budget = max(per_row, int(vmem_limit * 0.7) - weight_bytes)
    bb = budget // per_row
    bb = min(bb, _round_up(B, 16))                 # never larger than one padded tile
    if B >= 512:
        # >= 2 grid steps so both v7x TensorCores get work (neutral on v5e/v6e).
        bb = min(bb, max(256, _round_up(pl.cdiv(B, 2), 16)))
    bb = max(16, (bb // 16) * 16)
    return int(bb)


@functools.partial(jax.jit, static_argnames=("block_b", "use_bf16", "out_dtype"))
def denoising_autoencoder(x, params, *, block_b=None, use_bf16=False, out_dtype=None):
    """Fused autoencoder forward pass.

    x: (B, input_dim) float32
    params: dict with w1 (D,128), b1 (1,128), w2 (128,64), b2 (1,64),
                      w3 (64,128), b3 (1,128), w4 (128,D), b4 (1,D)
            (weights stored as (in_features, out_features), i.e. nn.Linear.weight.T)
    block_b: batch rows per grid step (auto-sized from VMEM budget if None).
    use_bf16: cast MXU operands (x, W) to bfloat16 in-kernel; accumulation and
              all elementwise math stay in f32 (valid on v5e/v6e/v7x).
    out_dtype: output dtype (default: x.dtype). bf16 output halves the write stream.
    """
    B, D = x.shape
    out_dtype = jnp.dtype(x.dtype if out_dtype is None else out_dtype)
    compute_dtype = jnp.bfloat16 if use_bf16 else jnp.float32

    bytes_in = jnp.dtype(x.dtype).itemsize
    bytes_out = out_dtype.itemsize
    bytes_w = jnp.dtype(compute_dtype).itemsize

    vmem_limit = _vmem_limit_bytes()
    if block_b is None:
        block_b = _pick_block_b(B, D, bytes_in, bytes_out, bytes_w, vmem_limit)
    else:
        block_b = max(16, _round_up(min(block_b, _round_up(B, 16)), 16))

    # Tiny weight casts (one-time, negligible); biases stay f32 for the VPU add.
    w1 = params["w1"].astype(compute_dtype)
    w2 = params["w2"].astype(compute_dtype)
    w3 = params["w3"].astype(compute_dtype)
    w4 = params["w4"].astype(compute_dtype)
    b1 = params["b1"].astype(jnp.float32)
    b2 = params["b2"].astype(jnp.float32)
    b3 = params["b3"].astype(jnp.float32)
    b4 = params["b4"].astype(jnp.float32)

    grid = (pl.cdiv(B, block_b),)

    def const(a):
        # Grid-invariant operand: constant index_map + single buffer (no waste).
        return pl.BlockSpec(a.shape, lambda i: (0, 0), pipeline_mode=pl.Buffered(1))

    weight_bytes = (w1.size + w2.size + w3.size + w4.size) * bytes_w \
        + (b1.size + b2.size + b3.size + b4.size) * 4
    cost = pl.CostEstimate(
        flops=2 * B * (2 * D * 128 + 2 * 128 * 64),
        transcendentals=B * D,                        # sigmoid
        bytes_accessed=B * D * (bytes_in + bytes_out) + weight_bytes,
    )

    out = pl.pallas_call(
        _dae_kernel,
        out_shape=jax.ShapeDtypeStruct((B, D), out_dtype),
        grid_spec=pl.GridSpec(
            grid=grid,
            in_specs=[
                pl.BlockSpec((block_b, D), lambda i: (i, 0)),   # x tile (no pad/cast)
                const(w1), const(b1),
                const(w2), const(b2),
                const(w3), const(b3),
                const(w4), const(b4),
            ],
            out_specs=pl.BlockSpec((block_b, D), lambda i: (i, 0)),
        ),
        compiler_params=pltpu.CompilerParams(
            dimension_semantics=("parallel",),
            vmem_limit_bytes=vmem_limit,
        ),
        cost_estimate=cost,
    )(x, w1, b1, w2, b2, w3, b3, w4, b4)

    return out


def init_params(key, input_dim):
    """Deterministic init mirroring nn.Linear default (Kaiming-uniform-ish)."""
    dims = [(input_dim, 128), (128, 64), (64, 128), (128, input_dim)]
    params = {}
    for idx, (fan_in, fan_out) in enumerate(dims, start=1):
        key, kw, kb = jax.random.split(key, 3)
        bound = 1.0 / jnp.sqrt(fan_in)
        params[f"w{idx}"] = jax.random.uniform(
            kw, (fan_in, fan_out), jnp.float32, -bound, bound)
        params[f"b{idx}"] = jax.random.uniform(
            kb, (1, fan_out), jnp.float32, -bound, bound)
    return params


def _reference_forward(x, p):
    h = jnp.maximum(x @ p["w1"] + p["b1"], 0.0)
    h = jnp.maximum(h @ p["w2"] + p["b2"], 0.0)
    h = jnp.maximum(h @ p["w3"] + p["b3"], 0.0)
    return jax.nn.sigmoid(h @ p["w4"] + p["b4"])


if __name__ == "__main__":
    key = jax.random.PRNGKey(0)
    k_x, k_x2, k_p = jax.random.split(key, 3)

    B, INPUT_DIM = 16, 32
    x = jax.random.normal(k_x, (B, INPUT_DIM), dtype=jnp.float32)
    params = init_params(k_p, INPUT_DIM)
    ref = _reference_forward(x, params)

    # f32 path (auto block_b): close match vs pure-JAX reference.
    out_f32 = jax.block_until_ready(denoising_autoencoder(x, params))
    assert out_f32.shape == (B, INPUT_DIM)
    assert jnp.allclose(out_f32, ref, atol=1e-5, rtol=1e-5), "f32 mismatch vs reference"

    # Ragged batch (B not a multiple of block_b) exercises cdiv-grid OOB masking.
    B2 = 37
    x2 = jax.random.normal(k_x2, (B2, INPUT_DIM), dtype=jnp.float32)
    ref2 = _reference_forward(x2, params)
    out2 = jax.block_until_ready(denoising_autoencoder(x2, params, block_b=16))
    assert out2.shape == (B2, INPUT_DIM)
    assert jnp.allclose(out2, ref2, atol=1e-5, rtol=1e-5), "ragged-batch mismatch"

    # bf16 operands + bf16 output (fast path on v6e/v7x; legal on v5e too).
    out_bf16 = jax.block_until_ready(
        denoising_autoencoder(x, params, use_bf16=True, out_dtype=jnp.bfloat16))
    assert out_bf16.shape == (B, INPUT_DIM)
    assert out_bf16.dtype == jnp.bfloat16
    assert jnp.allclose(out_bf16.astype(jnp.float32), ref, atol=5e-2, rtol=5e-2), \
        "bf16 mismatch vs reference"

    print("KERNEL_OK")
</pallas_src>

<mosaic_0001>
module attributes {stable_mosaic.version = 11 : i64} {
  func.func @_dae_kernel(%arg0: i32, %arg1: memref<16x32xf32, #tpu.memory_space<vmem>>, %arg2: memref<32x128xf32, #tpu.memory_space<vmem>>, %arg3: memref<1x128xf32, #tpu.memory_space<vmem>>, %arg4: memref<128x64xf32, #tpu.memory_space<vmem>>, %arg5: memref<1x64xf32, #tpu.memory_space<vmem>>, %arg6: memref<64x128xf32, #tpu.memory_space<vmem>>, %arg7: memref<1x128xf32, #tpu.memory_space<vmem>>, %arg8: memref<128x32xf32, #tpu.memory_space<vmem>>, %arg9: memref<1x32xf32, #tpu.memory_space<vmem>>, %arg10: memref<16x32xf32, #tpu.memory_space<vmem>>) attributes {dimension_semantics = [#tpu.dimension_semantics<parallel>], iteration_bounds = array<i64: 1>, scalar_prefetch = 0 : i64, scratch_operands = 0 : i64, tpu.core_type = #tpu.core_type<tc>, window_params = [{transform_indices = @transform_0, window_bounds = array<i64: 16, 32>}, {pipeline_mode = #tpu.pipeline_mode<synchronous>, transform_indices = @transform_1, window_bounds = array<i64: 32, 128>}, {pipeline_mode = #tpu.pipeline_mode<synchronous>, transform_indices = @transform_2, window_bounds = array<i64: 1, 128>}, {pipeline_mode = #tpu.pipeline_mode<synchronous>, transform_indices = @transform_3, window_bounds = array<i64: 128, 64>}, {pipeline_mode = #tpu.pipeline_mode<synchronous>, transform_indices = @transform_4, window_bounds = array<i64: 1, 64>}, {pipeline_mode = #tpu.pipeline_mode<synchronous>, transform_indices = @transform_5, window_bounds = array<i64: 64, 128>}, {pipeline_mode = #tpu.pipeline_mode<synchronous>, transform_indices = @transform_6, window_bounds = array<i64: 1, 128>}, {pipeline_mode = #tpu.pipeline_mode<synchronous>, transform_indices = @transform_7, window_bounds = array<i64: 128, 32>}, {pipeline_mode = #tpu.pipeline_mode<synchronous>, transform_indices = @transform_8, window_bounds = array<i64: 1, 32>}, {transform_indices = @transform_9, window_bounds = array<i64: 16, 32>}]} {
    %c0 = arith.constant 0 : index
    %c0_0 = arith.constant 0 : index
    %0 = vector.load %arg1[%c0, %c0_0] : memref<16x32xf32, #tpu.memory_space<vmem>>, vector<16x32xf32>
    %c0_1 = arith.constant 0 : index
    %c0_2 = arith.constant 0 : index
    %1 = vector.load %arg2[%c0_1, %c0_2] : memref<32x128xf32, #tpu.memory_space<vmem>>, vector<32x128xf32>
    %cst = arith.constant dense<0.000000e+00> : vector<16x128xf32>
    %2 = tpu.matmul %0, %1, %cst {dimension_numbers = #tpu.dot_dimension_numbers<[1], [0], [0], [1], [0, 0, 1, 1], [], []>} : vector<16x32xf32>, vector<32x128xf32>, vector<16x128xf32> -> vector<16x128xf32>
    %c0_3 = arith.constant 0 : index
    %c0_4 = arith.constant 0 : index
    %3 = vector.load %arg3[%c0_3, %c0_4] : memref<1x128xf32, #tpu.memory_space<vmem>>, vector<1x128xf32>
    %4 = vector.broadcast %3 : vector<1x128xf32> to vector<16x128xf32>
    %5 = arith.addf %2, %4 : vector<16x128xf32>
    %cst_5 = arith.constant 0.000000e+00 : f32
    %6 = vector.broadcast %cst_5 : f32 to vector<16x128xf32>
    %7 = arith.maximumf %5, %6 : vector<16x128xf32>
    %c0_6 = arith.constant 0 : index
    %c0_7 = arith.constant 0 : index
    %8 = vector.load %arg4[%c0_6, %c0_7] : memref<128x64xf32, #tpu.memory_space<vmem>>, vector<128x64xf32>
    %cst_8 = arith.constant dense<0.000000e+00> : vector<16x64xf32>
    %9 = tpu.matmul %7, %8, %cst_8 {dimension_numbers = #tpu.dot_dimension_numbers<[1], [0], [0], [1], [0, 0, 1, 1], [], []>} : vector<16x128xf32>, vector<128x64xf32>, vector<16x64xf32> -> vector<16x64xf32>
    %c0_9 = arith.constant 0 : index
    %c0_10 = arith.constant 0 : index
    %10 = vector.load %arg5[%c0_9, %c0_10] : memref<1x64xf32, #tpu.memory_space<vmem>>, vector<1x64xf32>
    %11 = vector.broadcast %10 : vector<1x64xf32> to vector<16x64xf32>
    %12 = arith.addf %9, %11 : vector<16x64xf32>
    %cst_11 = arith.constant 0.000000e+00 : f32
    %13 = vector.broadcast %cst_11 : f32 to vector<16x64xf32>
    %14 = arith.maximumf %12, %13 : vector<16x64xf32>
    %c0_12 = arith.constant 0 : index
    %c0_13 = arith.constant 0 : index
    %15 = vector.load %arg6[%c0_12, %c0_13] : memref<64x128xf32, #tpu.memory_space<vmem>>, vector<64x128xf32>
    %cst_14 = arith.constant dense<0.000000e+00> : vector<16x128xf32>
    %16 = tpu.matmul %14, %15, %cst_14 {dimension_numbers = #tpu.dot_dimension_numbers<[1], [0], [0], [1], [0, 0, 1, 1], [], []>} : vector<16x64xf32>, vector<64x128xf32>, vector<16x128xf32> -> vector<16x128xf32>
    %c0_15 = arith.constant 0 : index
    %c0_16 = arith.constant 0 : index
    %17 = vector.load %arg7[%c0_15, %c0_16] : memref<1x128xf32, #tpu.memory_space<vmem>>, vector<1x128xf32>
    %18 = vector.broadcast %17 : vector<1x128xf32> to vector<16x128xf32>
    %19 = arith.addf %16, %18 : vector<16x128xf32>
    %cst_17 = arith.constant 0.000000e+00 : f32
    %20 = vector.broadcast %cst_17 : f32 to vector<16x128xf32>
    %21 = arith.maximumf %19, %20 : vector<16x128xf32>
    %c0_18 = arith.constant 0 : index
    %c0_19 = arith.constant 0 : index
    %22 = vector.load %arg8[%c0_18, %c0_19] : memref<128x32xf32, #tpu.memory_space<vmem>>, vector<128x32xf32>
    %cst_20 = arith.constant dense<0.000000e+00> : vector<16x32xf32>
    %23 = tpu.matmul %21, %22, %cst_20 {dimension_numbers = #tpu.dot_dimension_numbers<[1], [0], [0], [1], [0, 0, 1, 1], [], []>} : vector<16x128xf32>, vector<128x32xf32>, vector<16x32xf32> -> vector<16x32xf32>
    %c0_21 = arith.constant 0 : index
    %c0_22 = arith.constant 0 : index
    %24 = vector.load %arg9[%c0_21, %c0_22] : memref<1x32xf32, #tpu.memory_space<vmem>>, vector<1x32xf32>
    %25 = vector.broadcast %24 : vector<1x32xf32> to vector<16x32xf32>
    %26 = arith.addf %23, %25 : vector<16x32xf32>
    %27 = arith.negf %26 : vector<16x32xf32>
    %28 = math.exp %27 : vector<16x32xf32>
    %cst_23 = arith.constant 1.000000e+00 : f32
    %29 = vector.broadcast %cst_23 : f32 to vector<16x32xf32>
    %30 = arith.addf %29, %28 : vector<16x32xf32>
    %31 = arith.divf %29, %30 : vector<16x32xf32>
    %c0_24 = arith.constant 0 : index
    %c0_25 = arith.constant 0 : index
    %32 = vector.load %arg10[%c0_24, %c0_25] : memref<16x32xf32, #tpu.memory_space<vmem>>, vector<16x32xf32>
    tpu.vector_store %arg10[%c0_24, %c0_25], %31 {strides = array<i32>} : memref<16x32xf32, #tpu.memory_space<vmem>>, vector<16x32xf32>,
    return
  }
  func.func @transform_0(%arg0: i32) -> (i32, i32) {
    %c0_i32 = arith.constant 0 : i32
    %c0_i32_0 = arith.constant 0 : i32
    return %arg0, %c0_i32 : i32, i32
  }
  func.func @transform_1(%arg0: i32) -> (i32, i32) {
    %c0_i32 = arith.constant 0 : i32
    %c0_i32_0 = arith.constant 0 : i32
    %c0_i32_1 = arith.constant 0 : i32
    return %c0_i32, %c0_i32_0 : i32, i32
  }
  func.func @transform_2(%arg0: i32) -> (i32, i32) {
    %c0_i32 = arith.constant 0 : i32
    %c0_i32_0 = arith.constant 0 : i32
    %c0_i32_1 = arith.constant 0 : i32
    return %c0_i32, %c0_i32_0 : i32, i32
  }
  func.func @transform_3(%arg0: i32) -> (i32, i32) {
    %c0_i32 = arith.constant 0 : i32
    %c0_i32_0 = arith.constant 0 : i32
    %c0_i32_1 = arith.constant 0 : i32
    return %c0_i32, %c0_i32_0 : i32, i32
  }
  func.func @transform_4(%arg0: i32) -> (i32, i32) {
    %c0_i32 = arith.constant 0 : i32
    %c0_i32_0 = arith.constant 0 : i32
    %c0_i32_1 = arith.constant 0 : i32
    return %c0_i32, %c0_i32_0 : i32, i32
  }
  func.func @transform_5(%arg0: i32) -> (i32, i32) {
    %c0_i32 = arith.constant 0 : i32
    %c0_i32_0 = arith.constant 0 : i32
    %c0_i32_1 = arith.constant 0 : i32
    return %c0_i32, %c0_i32_0 : i32, i32
  }
  func.func @transform_6(%arg0: i32) -> (i32, i32) {
    %c0_i32 = arith.constant 0 : i32
    %c0_i32_0 = arith.constant 0 : i32
    %c0_i32_1 = arith.constant 0 : i32
    return %c0_i32, %c0_i32_0 : i32, i32
  }
  func.func @transform_7(%arg0: i32) -> (i32, i32) {
    %c0_i32 = arith.constant 0 : i32
    %c0_i32_0 = arith.constant 0 : i32
    %c0_i32_1 = arith.constant 0 : i32
    return %c0_i32, %c0_i32_0 : i32, i32
  }
  func.func @transform_8(%arg0: i32) -> (i32, i32) {
    %c0_i32 = arith.constant 0 : i32
    %c0_i32_0 = arith.constant 0 : i32
    %c0_i32_1 = arith.constant 0 : i32
    return %c0_i32, %c0_i32_0 : i32, i32
  }
  func.func @transform_9(%arg0: i32) -> (i32, i32) {
    %c0_i32 = arith.constant 0 : i32
    %c0_i32_0 = arith.constant 0 : i32
    return %arg0, %c0_i32 : i32, i32
  }
}

</mosaic_0001>

<bundles_post_ra>
// kernel: denoising_autoencoder.1
= control target key start
LH: loop header
LB: loop body
LE: loop exit
PB: predicated region body
PF: predicated region fallthrough
CT: control target
= control target key end

     0   :  { %vm43_vm0 = vcmask 261120   ;;  %s522_s0 = inlined_call_operand.vmem [shape: f32[16,32], index: 0, kind: input, shape index: {}]   ;;  %s523_s1 = inlined_call_operand.vmem [shape: f32[32,128], index: 1, kind: input, shape index: {}]   ;;  %s524_s2 = inlined_call_operand.vmem [shape: f32[1,128], index: 2, kind: input, shape index: {}]   ;;  %s525_s3 = inlined_call_operand.vmem [shape: f32[128,64], index: 3, kind: input, shape index: {}]   ;;  %s526_s4 = inlined_call_operand.vmem [shape: f32[1,64], index: 4, kind: input, shape index: {}]   ;;  %s527_s5 = inlined_call_operand.vmem [shape: f32[64,128], index: 5, kind: input, shape index: {}]   ;;  %s528_s6 = inlined_call_operand.vmem [shape: f32[1,128], index: 6, kind: input, shape index: {}]   ;;  %s529_s7 = inlined_call_operand.vmem [shape: f32[128,32], index: 7, kind: input, shape index: {}]   ;;  %s530_s8 = inlined_call_operand.vmem [shape: f32[1,32], index: 8, kind: input, shape index: {}]   ;;  %s531_s9 = inlined_call_operand.hbm [shape: f32[16,32], index: 9, kind: output, shape index: {}]  }
   0x1   :  { %v38_v0 = vld [vmem:[%s523_s1 + $0x18] sm:$0xff]  ;;  %v37_v1 = vld [vmem:[%s523_s1 + $0x10] sm:$0xff]  ;;  %v36_v2 = vld [vmem:[%s523_s1 + $0x8] sm:$0xff] }
   0x2   :  { %62 = vmatpush.msra.mxu0 %v38_v0  ;;  %v90_v3 = vld [vmem:[%s525_s3 + $0x78] sm:$0xff]  ;;  %v89_v4 = vld [vmem:[%s525_s3 + $0x70] sm:$0xff]  ;;  %v35_v5 = vld [vmem:[%s523_s1] sm:$0xff] }
   0x3   :  { %95 = vmatpush.msra.mxu1 %v90_v3  ;;  %v88_v6 = vld [vmem:[%s525_s3 + $0x68] sm:$0xff]  ;;  %v33_v7 = vld [vmem:[%s522_s0] sm:$0xff]  ;;  %v86_v9 = vld [vmem:[%s525_s3 + $0x58] sm:$0xff] }
   0x4   :  { %63 = vmatpush.msra.mxu0 %v37_v1  ;;  %v87_v8 = vld [vmem:[%s525_s3 + $0x60] sm:$0xff] }
   0x5   :  { %96 = vmatpush.msra.mxu1 %v89_v4 }
   0x6   :  { %64 = vmatpush.msra.mxu0 %v36_v2 }
   0x7   :  { %97 = vmatpush.msra.mxu1 %v88_v6 }
   0x8   :  { %65 = vmatpush.msra.mxu0 %v35_v5 }
   0x9   :  { %265 = vmatmul.msk.f32.vlgmr.msra.gmra.mxu0 %vm43_vm0, %v33_v7 }
   0xa   :  { %14 = vsyncpa [#allocation3], 0  ;;  %98 = vmatpush.msra.mxu1 %v87_v8  ;;  %v85_v10 = vld [vmem:[%s525_s3 + $0x50] sm:$0xff]  ;;  %v84_v11 = vld [vmem:[%s525_s3 + $0x48] sm:$0xff]  ;;  %vm132_vm1 = vcmask 523264   ;;  %s253_s12 = sshll.u32 %s531_s9, 4  ;;  %s254_s12 = int_to_ptr.hbm [resolvable:$true] %s253_s12 }
   0xb   :  { %v34_v12 = vld [vmem:[%s522_s0 + $0x8] sm:$0xff]  ;;  %v83_v13 = vld [vmem:[%s525_s3 + $0x40] sm:$0xff]  ;;  %v82_v14 = vld [vmem:[%s525_s3 + $0x38] sm:$0xff]  ;;  %s313_s13 = smov 128   ;;  %s314_s14 = smov 8  }
   0xc   :  { %99 = vmatpush.msra.mxu1 %v86_v9  ;;  %v81_v15 = vld [vmem:[%s525_s3 + $0x30] sm:$0xff]  ;;  %v80_v16 = vld [vmem:[%s525_s3 + $0x28] sm:$0xff]  ;;  %v79_v17 = vld [vmem:[%s525_s3 + $0x20] sm:$0xff] }
   0xd   :  { %v78_v18 = vld [vmem:[%s525_s3 + $0x18] sm:$0xff]  ;;  %v77_v19 = vld [vmem:[%s525_s3 + $0x10] sm:$0xff]  ;;  %v76_v20 = vld [vmem:[%s525_s3 + $0x8] sm:$0xff] }
   0xe   :  { %100 = vmatpush.msra.mxu1 %v85_v10  ;;  %v75_v21 = vld [vmem:[%s525_s3] sm:$0xff]  ;;  %v127_v22 = vld [vmem:[%s527_s5 + $0x38] sm:$0xff]  ;;  %v126_v23 = vld [vmem:[%s527_s5 + $0x30] sm:$0xff] }
   0xf   :  { %147 = vmatpush.msra.mxu2 %v127_v22  ;;  %v125_v24 = vld [vmem:[%s527_s5 + $0x28] sm:$0xff]  ;;  %v124_v25 = vld [vmem:[%s527_s5 + $0x20] sm:$0xff]  ;;  %v123_v26 = vld [vmem:[%s527_s5 + $0x18] sm:$0xff] }
  0x10   :  { %101 = vmatpush.msra.mxu1 %v84_v11  ;;  %v274_v27 = vld [vmem:[%s524_s2] ss:$0 sm:$0xff]  ;;  %v122_v34 = vld [vmem:[%s527_s5 + $0x10] sm:$0xff]  ;;  %v121_v35 = vld [vmem:[%s527_s5 + $0x8] sm:$0xff] }
  0x11   :  { %266 = vmatmul.msk.f32.gmra.mxu0 %vm43_vm0, %v34_v12  ;;  %148 = vmatpush.msra.mxu2 %v126_v23  ;;  %v120_v36 = vld [vmem:[%s527_s5] sm:$0xff]  ;;  %v179_v37 = vld [vmem:[%s529_s7 + $0x78] sm:$0xff]  ;;  %v178_v38 = vld [vmem:[%s529_s7 + $0x70] sm:$0xff] }
  0x12   :  { %102 = vmatpush.msra.mxu1 %v83_v13  ;;  %184 = vmatpush.msra.mxu3 %v179_v37  ;;  %v177_v39 = vld [vmem:[%s529_s7 + $0x68] sm:$0xff]  ;;  %v176_v40 = vld [vmem:[%s529_s7 + $0x60] sm:$0xff]  ;;  %v175_v41 = vld [vmem:[%s529_s7 + $0x58] sm:$0xff] }
  0x13   :  { %149 = vmatpush.msra.mxu2 %v125_v24  ;;  %v174_v42 = vld [vmem:[%s529_s7 + $0x50] sm:$0xff]  ;;  %v173_v43 = vld [vmem:[%s529_s7 + $0x48] sm:$0xff]  ;;  %v172_v44 = vld [vmem:[%s529_s7 + $0x40] sm:$0xff] }
  0x14   :  { %103 = vmatpush.msra.mxu1 %v82_v14  ;;  %185 = vmatpush.msra.mxu3 %v178_v38  ;;  %v171_v45 = vld [vmem:[%s529_s7 + $0x38] sm:$0xff]  ;;  %v275_v46 = vld [vmem:[%s526_s4] ss:$0 sm:$0xff]  ;;  %v170_v47 = vld [vmem:[%s529_s7 + $0x30] sm:$0xff] }
  0x15   :  { %150 = vmatpush.msra.mxu2 %v124_v25  ;;  %v169_v48 = vld [vmem:[%s529_s7 + $0x28] sm:$0xff]  ;;  %v168_v51 = vld [vmem:[%s529_s7 + $0x20] sm:$0xff]  ;;  %v167_v53 = vld [vmem:[%s529_s7 + $0x18] sm:$0xff] }
  0x16   :  { %104 = vmatpush.msra.mxu1 %v81_v15  ;;  %186 = vmatpush.msra.mxu3 %v177_v39  ;;  %v166_v57 = vld [vmem:[%s529_s7 + $0x10] sm:$0xff]  ;;  %v165_v58 = vld [vmem:[%s529_s7 + $0x8] sm:$0xff]  ;;  %v164_v59 = vld [vmem:[%s529_s7] sm:$0xff] }
  0x17   :  { %151 = vmatpush.msra.mxu2 %v123_v26  ;;  %v276_v60 = vld [vmem:[%s528_s6] ss:$0 sm:$0xff]  ;;  %s312_s6 = smov [#allocation2]  }
  0x18   :  { %105 = vmatpush.msra.mxu1 %v80_v16  ;;  %187 = vmatpush.msra.mxu3 %v176_v40  ;;  %v277_v3 = vld [vmem:[%s530_s8] ss:$0 sm:$0xff]  ;;  %s251_s7 = sshll.u32 %s312_s6, 4  ;;  %s252_s7 = int_to_ptr.vmem [resolvable:$true] %s251_s7 }
  0x19   :  { %152 = vmatpush.msra.mxu2 %v122_v34 }
  0x1a   :  { %106 = vmatpush.msra.mxu1 %v79_v17  ;;  %188 = vmatpush.msra.mxu3 %v175_v41 }
  0x1b   :  { %153 = vmatpush.msra.mxu2 %v121_v35 }
  0x1c   :  { %107 = vmatpush.msra.mxu1 %v78_v18  ;;  %189 = vmatpush.msra.mxu3 %v174_v42 }
  0x1d   :  { %154 = vmatpush.msra.mxu2 %v120_v36 }
  0x1e   :  { %108 = vmatpush.msra.mxu1 %v77_v19  ;;  %190 = vmatpush.msra.mxu3 %v173_v43 }
  0x20   :  { %109 = vmatpush.msra.mxu1 %v76_v20  ;;  %191 = vmatpush.msra.mxu3 %v172_v44 }
  0x22   :  { %110 = vmatpush.msra.mxu1 %v75_v21  ;;  %192 = vmatpush.msra.mxu3 %v171_v45 }
  0x24   :  { %193 = vmatpush.msra.mxu3 %v170_v47 }
  0x26   :  { %194 = vmatpush.msra.mxu3 %v169_v48 }
  0x28   :  { %195 = vmatpush.msra.mxu3 %v168_v51 }
  0x2a   :  { %196 = vmatpush.msra.mxu3 %v167_v53 }
  0x2c   :  { %197 = vmatpush.msra.mxu3 %v166_v57 }
  0x2e   :  { %198 = vmatpush.msra.mxu3 %v165_v58 }
  0x30   :  { %199 = vmatpush.msra.mxu3 %v164_v59 }
  0x86   :  { %v67_v28 = vpop.f32.mrf.mxu0 }
  0x87   :  { %v68_v29 = vadd.f32 %v274_v27, %v67_v28 }
  0x89   :  { %v73_v30 = vmax.f32 %v68_v29, 0.0 }
  0x8b   :  { %111 = vmatmul.f32.vlgmr.msra.gmra.mxu1 %v73_v30 }
  0x8e   :  { %v70_v31 = vpop.f32.mrf.mxu0 }
  0x8f   :  { %v71_v32 = vadd.f32 %v274_v27, %v70_v31 }
  0x91   :  { %v74_v33 = vmax.f32 %v71_v32, 0.0 }
  0x93   :  { %114 = vmatmul.f32.gmra.mxu1 %v74_v33 }
 0x108   :  { %v112_v49 = vpop.f32.mrf.mxu1 }
 0x109   :  { %v113_v50 = vadd.f32 %v275_v46, %v112_v49 }
 0x10b   :  { %v118_v52 = vmax.f32 %v113_v50, 0.0 }
 0x10d   :  { %267 = vmatmul.msk.f32.vlgmr.msra.gmra.mxu2 %vm132_vm1, %v118_v52 }
 0x110   :  { %v115_v54 = vpop.f32.mrf.mxu1 }
 0x111   :  { %v116_v55 = vadd.f32 %v275_v46, %v115_v54 }
 0x113   :  { %v119_v56 = vmax.f32 %v116_v55, 0.0 }
 0x115   :  { %268 = vmatmul.msk.f32.gmra.mxu2 %vm132_vm1, %v119_v56 }
 0x190   :  { %v156_v61 = vpop.f32.mrf.mxu2 }
 0x191   :  { %v157_v62 = vadd.f32 %v276_v60, %v156_v61 }
 0x193   :  { %v162_v63 = vmax.f32 %v157_v62, 0.0 }
 0x195   :  { %200 = vmatmul.f32.vlgmr.msra.gmra.mxu3 %v162_v63 }
 0x198   :  { %v159_v0 = vpop.f32.mrf.mxu2 }
 0x199   :  { %v160_v1 = vadd.f32 %v276_v60, %v159_v0 }
 0x19b   :  { %v163_v2 = vmax.f32 %v160_v1, 0.0 }
 0x19d   :  { %203 = vmatmul.f32.gmra.mxu3 %v163_v2 }
 0x218   :  { %v201_v4 = vpop.f32.mrf.mxu3 }
 0x219   :  { %v202_v5 = vadd.f32 %v277_v3, %v201_v4 }
 0x21b   :  { %v269_v6 = vmul.f32 -1.442695, %v202_v5 }
 0x21d   :  { %278 = vpow2.f32 %v269_v6 }
 0x220   :  { %v204_v7 = vpop.f32.mrf.mxu3 }
 0x221   :  { %v205_v8 = vadd.f32 %v277_v3, %v204_v7 }
 0x223   :  { %v279_v9 = vpop.eup %278  ;;  %v270_v10 = vmul.f32 -1.442695, %v205_v8 }
 0x224   :  { %v213_v11 = vadd.f32 1.0, %v279_v9 }
 0x225   :  { %280 = vpow2.f32 %v270_v10 }
 0x226   :  { %282 = vrcp.f32 %v213_v11  ;;  %v226_v17 = vand.u32 2147483648, %v213_v11  ;;  %v224_v19 = vand.u32 2147483647, %v213_v11  ;;  %vm220_vm3 = vweird.f32 %v213_v11 }
 0x228   :  { %v227_v22 = vor.u32 1.1754944e-38, %v226_v17  ;;  %vm225_vm5 = vcmp.eq.f32.partialorder %v224_v19, 8.507059e+37 }
 0x22b   :  { %v281_v12 = vpop.eup %280 }
 0x22c   :  { %v283_v13 = vpop.eup %282  ;;  %v214_v14 = vadd.f32 1.0, %v281_v12 }
 0x22d   :  { %v216_v15 = vmul.f32 %v283_v13, %v213_v11  ;;  %vm221_vm2 = vweird.f32 %v283_v13 }
 0x22e   :  { %284 = vrcp.f32 %v214_v14  ;;  %vm222_vm4 = vmor %vm220_vm3, %vm221_vm2  ;;  %v241_v27 = vand.u32 2147483648, %v214_v14  ;;  %v239_v29 = vand.u32 2147483647, %v214_v14  ;;  %vm235_vm7 = vweird.f32 %v214_v14 }
 0x22f   :  { %v217_v16 = vsub.f32 1.0, %v216_v15 }
 0x230   :  { %v242_v31 = vor.u32 1.1754944e-38, %v241_v27  ;;  %vm240_vm9 = vcmp.eq.f32.partialorder %v239_v29, 8.507059e+37 }
 0x231   :  { %v218_v18 = vmul.f32 %v283_v13, %v217_v16 }
 0x233   :  { %v219_v20 = vadd.f32 %v283_v13, %v218_v18 }
 0x234   :  { %v285_v21 = vpop.eup %284 }
 0x235   :  { %v231_v23 = vmul.f32 %v285_v21, %v214_v14  ;;  %v223_v24 = vsel %vm222_vm4, %v283_v13, %v219_v20  ;;  %vm236_vm6 = vweird.f32 %v285_v21 }
 0x236   :  { %v228_v25 = vsel %vm225_vm5, %v227_v22, %v223_v24  ;;  %vm237_vm8 = vmor %vm235_vm7, %vm236_vm6 }
 0x237   :  { %v232_v26 = vsub.f32 1.0, %v231_v23  ;;  %245 = vst.msk [vmem:[#allocation2] sm:$0xff] %vm43_vm0, %v228_v25 }
 0x239   :  { %v233_v28 = vmul.f32 %v285_v21, %v232_v26 }
 0x23b   :  { %v234_v30 = vadd.f32 %v285_v21, %v233_v28 }
 0x23d   :  { %v238_v32 = vsel %vm237_vm8, %v285_v21, %v234_v30 }
 0x23e   :  { %v243_v33 = vsel %vm240_vm9, %v242_v31, %v238_v32 }
 0x23f   :  { %246 = vst.msk [vmem:[#allocation2 + $0x8] sm:$0xff] %vm43_vm0, %v243_v33 }
 0x240   :  { %259 = dma.vmem_to_hbm [thread:$0]  %s252_s7, 256, %s254_s12, [#allocation3], %s313_s13, %s313_s13, %s314_s14  }
 0x241   :  { %310 = dma.done.wait [#allocation3], 256  }
 0x242   :  { %311 = vsyncadd [#allocation3], 4294967040 }
 0x243   :  { %264 = vsyncpa [#allocation3], 1 }

</bundles_post_ra>
